<compile_context>
chip_gen: v6e
topology: v6e:2x2x1
jax: 0.10.0
libtpu: 0.0.40
codegen_flags: <defaults>
</compile_context>

<pallas_src>
import functools

import jax
import jax.numpy as jnp
from jax.experimental import pallas as pl
from jax.experimental.pallas import tpu as pltpu


def _conv_tanh_kernel(x_ref, w_ref, b_ref, o_ref, *, H, W, Cin, Cout, K, pad):
    """One grid step = one batch image.

    x_ref : (1, Cin, L)  lane-dense flat input, L = (H + 2*pad) * W + 2*pad
                         (rows zero-padded by `pad`, plus a `pad`-element
                          guard at each end of the flat axis)
    w_ref : (Cout, K*K*Cin)  weights, rows ordered (kh, kw, ci)
    b_ref : (Cout, 1)        bias (f32)
    o_ref : (1, Cout, H*W)   lane-dense output (free reshape to NCHW outside)
    """
    HW = H * W
    xf = x_ref[0]  # (Cin, L)

    # Column index of every output pixel — used to zero the left/right image
    # borders for taps whose horizontal offset steps outside the image.
    col = jax.lax.broadcasted_iota(jnp.int32, (1, HW), 1) % W

    patches = []
    for kh in range(K):
        for kw in range(K):
            start = kh * W + kw                       # static lane offset
            patch = xf[:, start:start + HW]           # (Cin, HW)
            d = kw - pad
            if d != 0:
                valid = jnp.logical_and(col + d >= 0, col + d < W)
                patch = jnp.where(valid, patch, jnp.zeros_like(patch))
            patches.append(patch)

    # Single MXU matmul: contraction = K*K*Cin, output lanes = H*W (dense).
    p_all = jnp.concatenate(patches, axis=0)          # (K*K*Cin, HW)
    acc = jnp.dot(w_ref[...], p_all, preferred_element_type=jnp.float32)
    acc = acc + b_ref[...].astype(jnp.float32)        # broadcast bias over H*W

    y = jnp.tanh(acc) * 0.5 + 0.5                     # f32 epilogue
    o_ref[0] = y.astype(o_ref.dtype)


def conv_bn_tanh_2d(x_nchw, weight, bias, *, padding=1):
    """tanh(conv2d(x, weight, bias; stride=1, dilation=1, groups=1)) / 2 + 0.5.

    x_nchw : (N, Cin, H, W)            (f32 or bf16)
    weight : (Cout, Cin, K, K)         PyTorch conv weight layout
    bias   : (Cout,)                   f32
    returns: (N, Cout, H, W), dtype of x_nchw
    """
    N, Cin, H, W = x_nchw.shape
    Cout, Cin_w, K, K2 = weight.shape
    assert Cin_w == Cin and K == K2
    assert 2 * padding == K - 1, "same-size conv (stride=1, dilation=1) expected"
    pad = padding
    HW = H * W
    L = (H + 2 * pad) * W + 2 * pad

    # Keep NCHW (no transpose). Pad rows by `pad`, flatten (H, W) onto the lane
    # axis, and add a `pad`-element guard at each end of the flat axis so every
    # tap window is a static, in-bounds lane slice inside the kernel.
    x_rows = jnp.pad(x_nchw, ((0, 0), (0, 0), (pad, pad), (0, 0)))
    x_flat = jnp.pad(x_rows.reshape(N, Cin, (H + 2 * pad) * W),
                     ((0, 0), (0, 0), (pad, pad)))

    # (Cout, Cin, K, K) -> (Cout, K*K*Cin), rows ordered (kh, kw, ci) to match
    # the in-kernel patch stacking order.
    w_mat = jnp.transpose(weight, (0, 2, 3, 1)).reshape(Cout, K * K * Cin)
    b_col = bias.reshape(Cout, 1).astype(jnp.float32)

    kernel = functools.partial(
        _conv_tanh_kernel, H=H, W=W, Cin=Cin, Cout=Cout, K=K, pad=pad
    )

    out_flat = pl.pallas_call(
        kernel,
        out_shape=jax.ShapeDtypeStruct((N, Cout, HW), x_nchw.dtype),
        grid_spec=pltpu.PrefetchScalarGridSpec(
            num_scalar_prefetch=0,
            grid=(N,),
            in_specs=[
                pl.BlockSpec((1, Cin, L), lambda n: (n, 0, 0)),
                pl.BlockSpec((Cout, K * K * Cin), lambda n: (0, 0)),
                pl.BlockSpec((Cout, 1), lambda n: (0, 0)),
            ],
            out_specs=pl.BlockSpec((1, Cout, HW), lambda n: (n, 0, 0)),
        ),
        compiler_params=pltpu.CompilerParams(
            dimension_semantics=("parallel",),
        ),
    )(x_flat, w_mat, b_col)

    return out_flat.reshape(N, Cout, H, W)


def _reference(x_nchw, weight, bias, *, padding=1):
    """Pure-JAX reference matching PyTorch conv2d + tanh/2 + 0.5 (f32)."""
    y = jax.lax.conv_general_dilated(
        x_nchw.astype(jnp.float32), weight.astype(jnp.float32),
        window_strides=(1, 1),
        padding=((padding, padding), (padding, padding)),
        dimension_numbers=("NCHW", "OIHW", "NCHW"),
        precision=jax.lax.Precision.HIGHEST,
    )
    y = y + bias.reshape(1, -1, 1, 1)
    return jnp.tanh(y) / 2.0 + 0.5


if __name__ == "__main__":
    # Shapes of FusionNetwork.decode1 = ConvBnTanh2d(vis_ch[0]=16, output=1).
    N, Cin, Cout, H, W, K = 2, 16, 1, 16, 16, 3

    key = jax.random.PRNGKey(0)
    kx, kw_, kb = jax.random.split(key, 3)

    x = jax.random.normal(kx, (N, Cin, H, W), dtype=jnp.float32)

    # PyTorch-like init: uniform(-bound, bound), bound = 1/sqrt(fan_in).
    fan_in = Cin * K * K
    bound = 1.0 / (fan_in ** 0.5)
    weight = jax.random.uniform(
        kw_, (Cout, Cin, K, K), jnp.float32, minval=-bound, maxval=bound
    )
    bias = jax.random.uniform(
        kb, (Cout,), jnp.float32, minval=-bound, maxval=bound
    )

    ref = jax.block_until_ready(_reference(x, weight, bias, padding=1))

    # f32 path (v5e-friendly, tight tolerance).
    out = jax.block_until_ready(conv_bn_tanh_2d(x, weight, bias, padding=1))
    assert out.shape == (N, Cout, H, W)
    assert jnp.max(jnp.abs(out - ref)) < 1e-5

    # bf16 MXU-operand path (v6e/v7x): f32 accumulate + f32 epilogue in-kernel.
    out_bf16 = jax.block_until_ready(
        conv_bn_tanh_2d(
            x.astype(jnp.bfloat16), weight.astype(jnp.bfloat16), bias, padding=1
        )
    )
    assert out_bf16.dtype == jnp.bfloat16
    assert jnp.max(jnp.abs(out_bf16.astype(jnp.float32) - ref)) < 5e-2

    print("KERNEL_OK")
</pallas_src>

<mosaic_0001>
module attributes {stable_mosaic.version = 11 : i64} {
  func.func @_conv_tanh_kernel(%arg0: i32, %arg1: memref<1x16x290xf32, #tpu.memory_space<vmem>>, %arg2: memref<1x144xf32, #tpu.memory_space<vmem>>, %arg3: memref<1x1xf32, #tpu.memory_space<vmem>>, %arg4: memref<1x1x256xf32, #tpu.memory_space<vmem>>) attributes {dimension_semantics = [#tpu.dimension_semantics<parallel>], iteration_bounds = array<i64: 2>, scalar_prefetch = 0 : i64, scratch_operands = 0 : i64, tpu.core_type = #tpu.core_type<tc>, window_params = [{transform_indices = @transform_0, window_bounds = array<i64: 1, 16, 290>}, {pipeline_mode = #tpu.pipeline_mode<synchronous>, transform_indices = @transform_1, window_bounds = array<i64: 1, 144>}, {pipeline_mode = #tpu.pipeline_mode<synchronous>, transform_indices = @transform_2, window_bounds = array<i64: 1, 1>}, {transform_indices = @transform_3, window_bounds = array<i64: 1, 1, 256>}]} {
    %c0 = arith.constant 0 : index
    %c0_0 = arith.constant 0 : index
    %c0_1 = arith.constant 0 : index
    %0 = vector.load %arg1[%c0, %c0_0, %c0_1] : memref<1x16x290xf32, #tpu.memory_space<vmem>>, vector<1x16x290xf32>
    %1 = vector.shape_cast %0 : vector<1x16x290xf32> to vector<16x290xf32>
    %2 = tpu.iota {dimensions = array<i32: 1>} : vector<1x256xi32>
    %c16_i32 = arith.constant 16 : i32
    %c0_i32 = arith.constant 0 : i32
    %3 = arith.cmpi eq, %c16_i32, %c0_i32 : i32
    %c1_i32 = arith.constant 1 : i32
    %4 = arith.select %3, %c1_i32, %c16_i32 : i32
    %5 = vector.broadcast %4 : i32 to vector<1x256xi32>
    %6 = arith.remsi %2, %5 : vector<1x256xi32>
    %c0_i32_2 = arith.constant 0 : i32
    %7 = vector.broadcast %c0_i32_2 : i32 to vector<1x256xi32>
    %8 = arith.cmpi ne, %6, %7 : vector<1x256xi32>
    %c0_i32_3 = arith.constant 0 : i32
    %9 = vector.broadcast %c0_i32_3 : i32 to vector<1x256xi32>
    %10 = arith.cmpi slt, %6, %9 : vector<1x256xi32>
    %c0_i32_4 = arith.constant 0 : i32
    %11 = arith.cmpi slt, %4, %c0_i32_4 : i32
    %12 = vector.broadcast %11 : i1 to vector<1x256xi1>
    %13 = vector.broadcast %12 : vector<1x256xi1> to vector<1x256xi1>
    %14 = arith.xori %10, %13 : vector<1x256xi1>
    %15 = arith.andi %14, %8 : vector<1x256xi1>
    %16 = vector.broadcast %4 : i32 to vector<1x256xi32>
    %17 = arith.addi %6, %16 : vector<1x256xi32>
    %18 = arith.select %15, %17, %6 : vector<1x256xi1>, vector<1x256xi32>
    %19 = vector.extract_strided_slice %1 {offsets = [0, 0], sizes = [16, 256], strides = [1, 1]} : vector<16x290xf32> to vector<16x256xf32>
    %c-1_i32 = arith.constant -1 : i32
    %20 = vector.broadcast %c-1_i32 : i32 to vector<1x256xi32>
    %21 = arith.addi %18, %20 : vector<1x256xi32>
    %c0_i32_5 = arith.constant 0 : i32
    %22 = vector.broadcast %c0_i32_5 : i32 to vector<1x256xi32>
    %23 = arith.cmpi sge, %21, %22 : vector<1x256xi32>
    %c-1_i32_6 = arith.constant -1 : i32
    %24 = vector.broadcast %c-1_i32_6 : i32 to vector<1x256xi32>
    %25 = arith.addi %18, %24 : vector<1x256xi32>
    %c16_i32_7 = arith.constant 16 : i32
    %26 = vector.broadcast %c16_i32_7 : i32 to vector<1x256xi32>
    %27 = arith.cmpi slt, %25, %26 : vector<1x256xi32>
    %28 = arith.andi %23, %27 : vector<1x256xi1>
    %cst = arith.constant 0.000000e+00 : f32
    %29 = vector.broadcast %cst : f32 to vector<16x256xf32>
    %30 = vector.shape_cast %28 : vector<1x256xi1> to vector<1x256xi1>
    %31 = vector.broadcast %30 : vector<1x256xi1> to vector<16x256xi1>
    %32 = arith.select %31, %19, %29 : vector<16x256xi1>, vector<16x256xf32>
    %33 = vector.extract_strided_slice %1 {offsets = [0, 1], sizes = [16, 256], strides = [1, 1]} : vector<16x290xf32> to vector<16x256xf32>
    %34 = vector.extract_strided_slice %1 {offsets = [0, 2], sizes = [16, 256], strides = [1, 1]} : vector<16x290xf32> to vector<16x256xf32>
    %c1_i32_8 = arith.constant 1 : i32
    %35 = vector.broadcast %c1_i32_8 : i32 to vector<1x256xi32>
    %36 = arith.addi %18, %35 : vector<1x256xi32>
    %c0_i32_9 = arith.constant 0 : i32
    %37 = vector.broadcast %c0_i32_9 : i32 to vector<1x256xi32>
    %38 = arith.cmpi sge, %36, %37 : vector<1x256xi32>
    %c1_i32_10 = arith.constant 1 : i32
    %39 = vector.broadcast %c1_i32_10 : i32 to vector<1x256xi32>
    %40 = arith.addi %18, %39 : vector<1x256xi32>
    %c16_i32_11 = arith.constant 16 : i32
    %41 = vector.broadcast %c16_i32_11 : i32 to vector<1x256xi32>
    %42 = arith.cmpi slt, %40, %41 : vector<1x256xi32>
    %43 = arith.andi %38, %42 : vector<1x256xi1>
    %cst_12 = arith.constant 0.000000e+00 : f32
    %44 = vector.broadcast %cst_12 : f32 to vector<16x256xf32>
    %45 = vector.shape_cast %43 : vector<1x256xi1> to vector<1x256xi1>
    %46 = vector.broadcast %45 : vector<1x256xi1> to vector<16x256xi1>
    %47 = arith.select %46, %34, %44 : vector<16x256xi1>, vector<16x256xf32>
    %48 = vector.extract_strided_slice %1 {offsets = [0, 16], sizes = [16, 256], strides = [1, 1]} : vector<16x290xf32> to vector<16x256xf32>
    %c-1_i32_13 = arith.constant -1 : i32
    %49 = vector.broadcast %c-1_i32_13 : i32 to vector<1x256xi32>
    %50 = arith.addi %18, %49 : vector<1x256xi32>
    %c0_i32_14 = arith.constant 0 : i32
    %51 = vector.broadcast %c0_i32_14 : i32 to vector<1x256xi32>
    %52 = arith.cmpi sge, %50, %51 : vector<1x256xi32>
    %c-1_i32_15 = arith.constant -1 : i32
    %53 = vector.broadcast %c-1_i32_15 : i32 to vector<1x256xi32>
    %54 = arith.addi %18, %53 : vector<1x256xi32>
    %c16_i32_16 = arith.constant 16 : i32
    %55 = vector.broadcast %c16_i32_16 : i32 to vector<1x256xi32>
    %56 = arith.cmpi slt, %54, %55 : vector<1x256xi32>
    %57 = arith.andi %52, %56 : vector<1x256xi1>
    %cst_17 = arith.constant 0.000000e+00 : f32
    %58 = vector.broadcast %cst_17 : f32 to vector<16x256xf32>
    %59 = vector.shape_cast %57 : vector<1x256xi1> to vector<1x256xi1>
    %60 = vector.broadcast %59 : vector<1x256xi1> to vector<16x256xi1>
    %61 = arith.select %60, %48, %58 : vector<16x256xi1>, vector<16x256xf32>
    %62 = vector.extract_strided_slice %1 {offsets = [0, 17], sizes = [16, 256], strides = [1, 1]} : vector<16x290xf32> to vector<16x256xf32>
    %63 = vector.extract_strided_slice %1 {offsets = [0, 18], sizes = [16, 256], strides = [1, 1]} : vector<16x290xf32> to vector<16x256xf32>
    %c1_i32_18 = arith.constant 1 : i32
    %64 = vector.broadcast %c1_i32_18 : i32 to vector<1x256xi32>
    %65 = arith.addi %18, %64 : vector<1x256xi32>
    %c0_i32_19 = arith.constant 0 : i32
    %66 = vector.broadcast %c0_i32_19 : i32 to vector<1x256xi32>
    %67 = arith.cmpi sge, %65, %66 : vector<1x256xi32>
    %c1_i32_20 = arith.constant 1 : i32
    %68 = vector.broadcast %c1_i32_20 : i32 to vector<1x256xi32>
    %69 = arith.addi %18, %68 : vector<1x256xi32>
    %c16_i32_21 = arith.constant 16 : i32
    %70 = vector.broadcast %c16_i32_21 : i32 to vector<1x256xi32>
    %71 = arith.cmpi slt, %69, %70 : vector<1x256xi32>
    %72 = arith.andi %67, %71 : vector<1x256xi1>
    %cst_22 = arith.constant 0.000000e+00 : f32
    %73 = vector.broadcast %cst_22 : f32 to vector<16x256xf32>
    %74 = vector.shape_cast %72 : vector<1x256xi1> to vector<1x256xi1>
    %75 = vector.broadcast %74 : vector<1x256xi1> to vector<16x256xi1>
    %76 = arith.select %75, %63, %73 : vector<16x256xi1>, vector<16x256xf32>
    %77 = vector.extract_strided_slice %1 {offsets = [0, 32], sizes = [16, 256], strides = [1, 1]} : vector<16x290xf32> to vector<16x256xf32>
    %c-1_i32_23 = arith.constant -1 : i32
    %78 = vector.broadcast %c-1_i32_23 : i32 to vector<1x256xi32>
    %79 = arith.addi %18, %78 : vector<1x256xi32>
    %c0_i32_24 = arith.constant 0 : i32
    %80 = vector.broadcast %c0_i32_24 : i32 to vector<1x256xi32>
    %81 = arith.cmpi sge, %79, %80 : vector<1x256xi32>
    %c-1_i32_25 = arith.constant -1 : i32
    %82 = vector.broadcast %c-1_i32_25 : i32 to vector<1x256xi32>
    %83 = arith.addi %18, %82 : vector<1x256xi32>
    %c16_i32_26 = arith.constant 16 : i32
    %84 = vector.broadcast %c16_i32_26 : i32 to vector<1x256xi32>
    %85 = arith.cmpi slt, %83, %84 : vector<1x256xi32>
    %86 = arith.andi %81, %85 : vector<1x256xi1>
    %cst_27 = arith.constant 0.000000e+00 : f32
    %87 = vector.broadcast %cst_27 : f32 to vector<16x256xf32>
    %88 = vector.shape_cast %86 : vector<1x256xi1> to vector<1x256xi1>
    %89 = vector.broadcast %88 : vector<1x256xi1> to vector<16x256xi1>
    %90 = arith.select %89, %77, %87 : vector<16x256xi1>, vector<16x256xf32>
    %91 = vector.extract_strided_slice %1 {offsets = [0, 33], sizes = [16, 256], strides = [1, 1]} : vector<16x290xf32> to vector<16x256xf32>
    %92 = vector.extract_strided_slice %1 {offsets = [0, 34], sizes = [16, 256], strides = [1, 1]} : vector<16x290xf32> to vector<16x256xf32>
    %c1_i32_28 = arith.constant 1 : i32
    %93 = vector.broadcast %c1_i32_28 : i32 to vector<1x256xi32>
    %94 = arith.addi %18, %93 : vector<1x256xi32>
    %c0_i32_29 = arith.constant 0 : i32
    %95 = vector.broadcast %c0_i32_29 : i32 to vector<1x256xi32>
    %96 = arith.cmpi sge, %94, %95 : vector<1x256xi32>
    %c1_i32_30 = arith.constant 1 : i32
    %97 = vector.broadcast %c1_i32_30 : i32 to vector<1x256xi32>
    %98 = arith.addi %18, %97 : vector<1x256xi32>
    %c16_i32_31 = arith.constant 16 : i32
    %99 = vector.broadcast %c16_i32_31 : i32 to vector<1x256xi32>
    %100 = arith.cmpi slt, %98, %99 : vector<1x256xi32>
    %101 = arith.andi %96, %100 : vector<1x256xi1>
    %cst_32 = arith.constant 0.000000e+00 : f32
    %102 = vector.broadcast %cst_32 : f32 to vector<16x256xf32>
    %103 = vector.shape_cast %101 : vector<1x256xi1> to vector<1x256xi1>
    %104 = vector.broadcast %103 : vector<1x256xi1> to vector<16x256xi1>
    %105 = arith.select %104, %92, %102 : vector<16x256xi1>, vector<16x256xf32>
    %106 = tpu.concatenate %32, %33, %47, %61, %62, %76, %90, %91, %105 in 0 : vector<16x256xf32>, vector<16x256xf32>, vector<16x256xf32>, vector<16x256xf32>, vector<16x256xf32>, vector<16x256xf32>, vector<16x256xf32>, vector<16x256xf32>, vector<16x256xf32> -> vector<144x256xf32>
    %c0_33 = arith.constant 0 : index
    %c0_34 = arith.constant 0 : index
    %107 = vector.load %arg2[%c0_33, %c0_34] : memref<1x144xf32, #tpu.memory_space<vmem>>, vector<1x144xf32>
    %cst_35 = arith.constant dense<0.000000e+00> : vector<1x256xf32>
    %108 = tpu.matmul %107, %106, %cst_35 {dimension_numbers = #tpu.dot_dimension_numbers<[1], [0], [0], [1], [0, 0, 1, 1], [], []>} : vector<1x144xf32>, vector<144x256xf32>, vector<1x256xf32> -> vector<1x256xf32>
    %c0_36 = arith.constant 0 : index
    %c0_37 = arith.constant 0 : index
    %109 = vector.load %arg3[%c0_36, %c0_37] : memref<1x1xf32, #tpu.memory_space<vmem>>, vector<1x1xf32>
    %110 = vector.broadcast %109 : vector<1x1xf32> to vector<1x256xf32>
    %111 = arith.addf %108, %110 : vector<1x256xf32>
    %112 = math.tanh %111 : vector<1x256xf32>
    %cst_38 = arith.constant 5.000000e-01 : f32
    %113 = vector.broadcast %cst_38 : f32 to vector<1x256xf32>
    %114 = arith.mulf %112, %113 : vector<1x256xf32>
    %cst_39 = arith.constant 5.000000e-01 : f32
    %115 = vector.broadcast %cst_39 : f32 to vector<1x256xf32>
    %116 = arith.addf %114, %115 : vector<1x256xf32>
    %c0_40 = arith.constant 0 : index
    %c0_41 = arith.constant 0 : index
    %c0_42 = arith.constant 0 : index
    %117 = vector.load %arg4[%c0_40, %c0_41, %c0_42] : memref<1x1x256xf32, #tpu.memory_space<vmem>>, vector<1x1x256xf32>
    %118 = vector.shape_cast %117 : vector<1x1x256xf32> to vector<1x256xf32>
    %119 = vector.shape_cast %116 : vector<1x256xf32> to vector<1x1x256xf32>
    tpu.vector_store %arg4[%c0_40, %c0_41, %c0_42], %119 {strides = array<i32>} : memref<1x1x256xf32, #tpu.memory_space<vmem>>, vector<1x1x256xf32>,
    return
  }
  func.func @transform_0(%arg0: i32) -> (i32, i32, i32) {
    %c0_i32 = arith.constant 0 : i32
    %c0_i32_0 = arith.constant 0 : i32
    %c0_i32_1 = arith.constant 0 : i32
    return %arg0, %c0_i32, %c0_i32_0 : i32, i32, i32
  }
  func.func @transform_1(%arg0: i32) -> (i32, i32) {
    %c0_i32 = arith.constant 0 : i32
    %c0_i32_0 = arith.constant 0 : i32
    %c0_i32_1 = arith.constant 0 : i32
    return %c0_i32, %c0_i32_0 : i32, i32
  }
  func.func @transform_2(%arg0: i32) -> (i32, i32) {
    %c0_i32 = arith.constant 0 : i32
    %c0_i32_0 = arith.constant 0 : i32
    %c0_i32_1 = arith.constant 0 : i32
    return %c0_i32, %c0_i32_0 : i32, i32
  }
  func.func @transform_3(%arg0: i32) -> (i32, i32, i32) {
    %c0_i32 = arith.constant 0 : i32
    %c0_i32_0 = arith.constant 0 : i32
    %c0_i32_1 = arith.constant 0 : i32
    return %arg0, %c0_i32, %c0_i32_0 : i32, i32, i32
  }
}

</mosaic_0001>

<bundles_post_ra>
// kernel: tpu_custom_call.1
= control target key start
LH: loop header
LB: loop body
LE: loop exit
PB: predicated region body
PF: predicated region fallthrough
CT: control target
= control target key end

     0   :  { %s1155_s0 = inlined_call_operand.hbm [shape: f32[2,16,290], index: 0, kind: input, shape index: {}]   ;;  %s1156_s1 = inlined_call_operand.vmem [shape: f32[1,144], index: 1, kind: input, shape index: {}]   ;;  %s1157_s2 = inlined_call_operand.<no memory space> [shape: f32[1,1], index: 2, kind: input, shape index: {}]   ;;  %s1158_s3 = inlined_call_operand.hbm [shape: f32[2,1,256], index: 3, kind: output, shape index: {}]  }
   0x1   :  { %v8_v0 = vstv %s1157_s2 }
   0x2   :  { %9 = vst [vmem:[#allocation2] sm:$0x1] %v8_v0 }
   0x3   :  { %10 = vsyncpa [#allocation4], 0 }
   0x4   :  { %12 = vsyncpa [#allocation4 + $0x1], 0 }
   0x5   :  { %13 = vsyncpa [#allocation5], 0 }
   0x6   :  { %15 = vsyncpa [#allocation5 + $0x1], 0  ;;  %s889_s14 = smov 0   ;;  %s891_s15 = smov 0  }
   0x7   :  { %s893_s16 = smov 0   ;;  %s895_s17 = smov 0  }
   0x8 LB: > { %s910_s2 = sadd.s32 4294967295, %s850_s17   ;;  %s655_s18 = sadd.s32 4294967294, %s850_s17   ;;  %s850_s17 = sphi %s895_s17, %s1172_s17   ;;  %s846_s16 = sphi %s893_s16, %s1171_s16   ;;  %s842_s15 = sphi %s891_s15, %s1170_s15   ;;  %s838_s14 = sphi %s889_s14, %s1169_s14  }
   0x9   : > { %s914_s19 = sadd.s32 1, %s850_s17   ;;  %s28_s20 = sadd.s32 1, %s846_s16 }
   0xa   : > { %s25_s21 = ssub.s32 %s850_s17, %s914_s19  ;;  %p35_p0 = scmp.ne.s32.totalorder %s846_s16, %s842_s15 }
   0xb   : > { %p26_p1 = scmp.eq.s32.totalorder %s25_s21, 0  ;;  %p36_p2 = scmp.eq.s32.totalorder %s850_s17, 0 }
   0xc   : > { %p41_p3 = scmp.ne.s32.totalorder %s842_s15, %s838_s14  ;;  %p42_p4 = scmp.eq.s32.totalorder %s910_s2, 0 }
   0xd   : > { %s926_s22 = scalar_select %p26_p1, %s846_s16, %s28_s20  }
   0xe   : > { %p37_p5 = por %p36_p2, %p35_p0  ;;  %p928_p6 = por %p42_p4, %p41_p3 }
   0xf   : > { %p107_p7 = scmp.eq.s32.totalorder %s910_s2, 1  ;;  %p113_p8 = scmp.eq.s32.totalorder %s655_s18, 1 }
  0x10   : > { %s1161_s23 = scalar_select %p928_p6, 1, 0 }
  0x11   : > { %p707_p10 = scmp.lt.s32.totalorder %s850_s17, 2  ;;  %p935_p11 = por %p107_p7, %p35_p0 }
  0x12   : > { %p939_p12 = por %p113_p8, %p41_p3  ;;  %s139_s26 = sand.u32 1, %s846_s16  }
  0x13   : > { %s1162_s24 = scalar_select %p935_p11, 1, 0 }
  0x14   : > { %s1163_s25 = scalar_select %p939_p12, 1, 0 }
  0x15   : > { %s693_s27 = smul.u32 768, %s850_s17  ;;  %p950_p13 = pnand %p707_p10, %p37_p5 }
  0x16   : > { %s692_s28 = smul.u32 48, %s139_s26  ;;  %s956_s8 = scalar_lea.sflag [#allocation4], %s139_s26 }
  0x17   : > { %s948_s4 = scalar_lea.hbm %s1155_s0, %s693_s27  ;;  %p760_p1 = pneg %p950_p13 }
  0x18   : > { %s143_s6 = scalar_lea.vmem [#allocation3], %s692_s28  ;;  %s758_s9 = scalar_lea.hbm %s948_s4, 768 }
  0x19   : > { %s150_s7 = sshll.u32 %s143_s6, 4  ;;  %p759_p0 = scmp.ne.s32.totalorder %s948_s4, %s758_s9  ;;  %s954_s7 = int_to_ptr.vmem [resolvable:$true] %s150_s7 }
  0x1a   : > { %s763_s12 = scalar_lea.hbm %s1155_s0, 1536  ;;  %p764_p4 = scmp.lt.s32.totalorder %s948_s4, %s1155_s0 }
  0x1b   : > { %p761_p2 = pnand %p760_p1, %p759_p0  ;;  %p765_p5 = scmp.lt.s32.totalorder %s763_s12, %s758_s9 }
  0x1d   : > { %p762_p3 = pneg %p761_p2  ;;  %p766_p7 = por %p765_p5, %p764_p4 }
  0x1f   : > { %p767_p8 = pnand %p766_p7, %p762_p3 }
  0x21   : > { %770 = shalt.err (!%p767_p8)
}
  0x22   : > { %s771_s20 = scalar_lea.vmem %s954_s7, 768  ;;  %s852_s21 = smov [#allocation3]  }
  0x23   : > { %p772_p10 = scmp.ne.s32.totalorder %s954_s7, %s771_s20  ;;  %s776_s26 = sshll.u32 %s852_s21, 4  ;;  %s777_s26 = int_to_ptr.vmem [resolvable:$false] %s776_s26 }
  0x24   : > { %s778_s27 = scalar_lea.vmem %s777_s26, 1536  ;;  %p779_p2 = scmp.lt.s32.totalorder %s954_s7, %s777_s26 }
  0x25   : > { %p774_p9 = pnand %p772_p10, %p760_p1  ;;  %p780_p12 = scmp.lt.s32.totalorder %s778_s27, %s771_s20 }
  0x27   : > { %p775_p0 = pneg %p774_p9  ;;  %p781_p11 = por %p780_p12, %p779_p2 }
  0x29   : > { %p782_p6 = pnand %p781_p11, %p775_p0 }
  0x2b   : > { %785 = shalt.err (!%p782_p6)
}
  0x2c   : > { %s853_s28 = smov 384   ;;  %s854_s29 = smov 24  }
  0x2d   : > { %702 = dma.hbm_to_vmem [thread:$0]  (!%p950_p13), %s948_s4, 768, %s954_s7, %s956_s8, %s853_s28, %s853_s28, %s854_s29  }
  0x2e   : > { %p659_p9 = scmp.ge.s32.totalorder %s850_s17, 1  ;;  %p158_p1 = scmp.lt.s32.totalorder %s850_s17, 3 }
  0x30   : > { %p159_p3 = pnand %p659_p9, %p158_p1 }
  0x31   : > { %s980_s30 = sand.u32 (!%p159_p3), 1, %s842_s15   ;;  %p1165_p6 = scmp.ne.s32.totalorder (!%p159_p3), %s1161_s23, 0 }
  0x32   : > { %162 = sbr.rel (%p159_p3) target bundleno = 501 (0x1f5), region = 32  ;;  %s165_s9 = scalar_lea.sflag (!%p159_p3), [#allocation4], %s980_s30 }
  0x33   : > { %s694_s6 = smul.u32 (!%p159_p3), 48, %s980_s30 }
  0x35   : > { %s168_s10 = scalar_lea.vmem (!%p159_p3), [#allocation3], %s694_s6 }
  0x37   : > { %829 = dma.done.wait (%p1165_p6), %s165_s9, 768  }
  0x38   : > { %831 = vsyncadd (%p1165_p6), %s165_s9, 4294966528  ;;  %v988_v1 = vld [vmem:[%s168_s10 + $0x20] sm:$0xff]  ;;  %v990_v2 = vld [vmem:[%s168_s10 + $0x18] sm:$0xff]  ;;  %s855_s4 = smov 95   ;;  %s856_s23 = smov 96   ;;  %v197_v7 = vlaneseq  ;;  %vm467_vm0 = vcmask 130048  }
  0x39   : > { %433 = vrot.lane.b32.xlu0 %v988_v1, %s855_s4  ;;  %431 = vrot.lane.b32.xlu1 %v990_v2, %s855_s4  ;;  %v196_v3 = vld [vmem:[%s168_s10 + $0x28] sm:$0xff]  ;;  %v193_v5 = vld [vmem:[%s168_s10 + $0x10] sm:$0xff]  ;;  %s857_s5 = smov 110   ;;  %s858_s7 = smov 111   ;;  %v862_v12 = vmov 0   ;;  %vm437_vm1 = vcmask 777216  }
  0x3a   : > { %v994_v4 = vld [vmem:[%s168_s10 + $0x8] sm:$0xff]  ;;  %v997_v6 = vld [vmem:[%s168_s10] sm:$0xff]  ;;  %s859_s8 = smov 112   ;;  %s860_s11 = smov 126   ;;  %v1022_v8 = vshrl.u32 %v197_v7, 7  ;;  %753 = vset.pattern.permute.xlu0 %v862_v12  ;;  %v198_v14 = vand.u32 127, %v197_v7 }
  0x3b   : > { %s861_s12 = smov 127   ;;  %v1030_v10 = vld [vmem:[%s1156_s1] sm:$0x3]  ;;  %s863_s20 = smov 94   ;;  %vm345_vm2 = vcmask 785408   ;;  %vm320_vm5 = vcmask 900096  }
  0x3c   : > { %v464_v9 = vsub.s32 1, %v1022_v8  ;;  %v447_v13 = vld [vmem:[#allocation2] sm:$0x1]  ;;  %v199_v15 = vadd.s32 128, %v198_v14  ;;  %v204_v24 = vand.u32 15, %v198_v14  ;;  %vm416_vm8 = vcmask 908288  }
  0x3d   : > { %435 = vrot.lane.b32.xlu0 %v196_v3, %s855_s4  ;;  %427 = vrot.lane.b32.xlu1 %v994_v4, %s855_s4  ;;  %vm295_vm9 = vcmask 916480   ;;  %vm270_vm10 = vcmask 1031168   ;;  %vm395_vm11 = vcmask 1039360   ;;  %vm370_vm12 = vcmask 769024   ;;  %s660_s21 = sshll.u32 %s980_s30, 1  ;;  %s691_s26 = sshll.u32 %s910_s2, 5 }
  0x3e   : > { %v465_v11 = vrot.slane %v1030_v10, %v464_v9  ;;  %v211_v18 = vand.u32 15, %v199_v15  ;;  %v1042_v29 = vadd.s32 4294967295, %v204_v24  ;;  %v1060_v41 = vadd.s32 1, %v204_v24  ;;  %s190_s27 = scalar_lea.vmem [#allocation6], %s660_s21  ;;  %s583_s9 = scalar_lea.hbm %s1158_s3, %s691_s26 }
  0x3f   : > { %s585_s28 = sshll.u32 %s190_s27, 4  ;;  %vm567_vm13 = vcmp.lt.s32.totalorder %v197_v7, 256  ;;  %s571_s10 = scalar_lea.sflag [#allocation5], %s980_s30  ;;  %s586_s28 = int_to_ptr.vmem [resolvable:$true] %s585_s28 }
  0x40   : > { %685 = vmatprep.mubr.msk.f32.mxu0 %vm467_vm0, %v465_v11  ;;  %v1039_v23 = vadd.s32 4294967295, %v211_v18  ;;  %vm226_vm4 = vcmp.ge.s32.totalorder %v1042_v29, 0  ;;  %v1051_v36 = vadd.s32 1, %v211_v18  ;;  %vm244_vm7 = vcmp.lt.s32.totalorder %v1060_v41, 16  ;;  %p1166_p12 = scmp.ne.s32.totalorder %s1162_s24, 0 }
  0x41   : > { %429 = vrot.lane.b32.xlu0 %v193_v5, %s855_s4  ;;  %425 = vrot.lane.b32.xlu1 %v997_v6, %s855_s4  ;;  %s786_s4 = scalar_lea.vmem %s586_s28, 32 }
  0x42   : > { %vm227_vm3 = vcmp.ge.s32.totalorder %v1039_v23, 0  ;;  %vm245_vm6 = vcmp.lt.s32.totalorder %v1051_v36, 16  ;;  %p787_p11 = scmp.ne.s32.totalorder %s586_s28, %s786_s4 }
  0x44   : > { %p788_p13 = pnand %p787_p11, %p1166_p12 }
  0x45   : > { %341 = vrot.lane.b32.xlu0 %v988_v1, %s856_s23  ;;  %343 = vrot.lane.b32.xlu1 %v196_v3, %s856_s23 }
  0x46   : > { %p789_p4 = pneg %p788_p13 }
  0x49   : > { %339 = vrot.lane.b32.xlu0 %v990_v2, %s856_s23  ;;  %335 = vrot.lane.b32.xlu1 %v994_v4, %s856_s23 }
  0x4d   : > { %337 = vrot.lane.b32.xlu0 %v193_v5, %s856_s23  ;;  %333 = vrot.lane.b32.xlu1 %v997_v6, %s856_s23  ;;  %s865_s23 = smov [#allocation6]  }
  0x4e   : > { %s790_s2 = sshll.u32 %s865_s23, 4  ;;  %s791_s2 = int_to_ptr.vmem [resolvable:$false] %s790_s2 }
  0x4f   : > { %p793_p5 = scmp.lt.s32.totalorder %s586_s28, %s791_s2 }
  0x51   : > { %316 = vrot.lane.b32.xlu0 %v988_v1, %s857_s5  ;;  %318 = vrot.lane.b32.xlu1 %v196_v3, %s857_s5 }
  0x55   : > { %314 = vrot.lane.b32.xlu0 %v990_v2, %s857_s5  ;;  %310 = vrot.lane.b32.xlu1 %v994_v4, %s857_s5 }
  0x59   : > { %312 = vrot.lane.b32.xlu0 %v193_v5, %s857_s5  ;;  %308 = vrot.lane.b32.xlu1 %v997_v6, %s857_s5  ;;  %s792_s5 = scalar_lea.vmem %s791_s2, 64 }
  0x5a   : > { %p794_p7 = scmp.lt.s32.totalorder %s792_s5, %s786_s4 }
  0x5c   : > { %p795_p8 = por %p794_p7, %p793_p5 }
  0x5d   : > { %412 = vrot.lane.b32.xlu0 %v988_v1, %s858_s7  ;;  %414 = vrot.lane.b32.xlu1 %v196_v3, %s858_s7 }
  0x5e   : > { %p796_p10 = pnand %p795_p8, %p789_p4 }
  0x61   : > { %410 = vrot.lane.b32.xlu0 %v990_v2, %s858_s7  ;;  %406 = vrot.lane.b32.xlu1 %v994_v4, %s858_s7 }
  0x65   : > { %408 = vrot.lane.b32.xlu0 %v193_v5, %s858_s7  ;;  %404 = vrot.lane.b32.xlu1 %v997_v6, %s858_s7 }
  0x69   : > { %291 = vrot.lane.b32.xlu0 %v988_v1, %s859_s8  ;;  %293 = vrot.lane.b32.xlu1 %v196_v3, %s859_s8 }
  0x6d   : > { %289 = vrot.lane.b32.xlu0 %v990_v2, %s859_s8  ;;  %285 = vrot.lane.b32.xlu1 %v994_v4, %s859_s8 }
  0x71   : > { %287 = vrot.lane.b32.xlu0 %v193_v5, %s859_s8  ;;  %283 = vrot.lane.b32.xlu1 %v997_v6, %s859_s8 }
  0x75   : > { %266 = vrot.lane.b32.xlu0 %v988_v1, %s860_s11  ;;  %268 = vrot.lane.b32.xlu1 %v196_v3, %s860_s11 }
  0x79   : > { %264 = vrot.lane.b32.xlu0 %v990_v2, %s860_s11  ;;  %260 = vrot.lane.b32.xlu1 %v994_v4, %s860_s11 }
  0x7d   : > { %262 = vrot.lane.b32.xlu0 %v193_v5, %s860_s11  ;;  %258 = vrot.lane.b32.xlu1 %v997_v6, %s860_s11 }
  0x81   : > { %391 = vrot.lane.b32.xlu0 %v988_v1, %s861_s12  ;;  %393 = vrot.lane.b32.xlu1 %v196_v3, %s861_s12 }
  0x85   : > { %389 = vrot.lane.b32.xlu0 %v990_v2, %s861_s12  ;;  %385 = vrot.lane.b32.xlu1 %v994_v4, %s861_s12 }
  0x89   : > { %387 = vrot.lane.b32.xlu0 %v193_v5, %s861_s12  ;;  %383 = vrot.lane.b32.xlu1 %v997_v6, %s861_s12 }
  0x8d   : > { %366 = vrot.lane.b32.xlu0 %v988_v1, %s863_s20  ;;  %368 = vrot.lane.b32.xlu1 %v196_v3, %s863_s20 }
  0x91   : > { %364 = vrot.lane.b32.xlu0 %v990_v2, %s863_s20  ;;  %360 = vrot.lane.b32.xlu1 %v994_v4, %s863_s20 }
  0x95   : > { %362 = vrot.lane.b32.xlu0 %v193_v5, %s863_s20  ;;  %358 = vrot.lane.b32.xlu1 %v997_v6, %s863_s20 }
  0x99   : > { %450 = vperm.xlu0 %753, %v447_v13  }
  0xab   : > { %v434_v16 = vpop.permute.xlu0 %433  ;;  %v432_v17 = vpop.permute.xlu1 %431 }
  0xac   : > { %v440_v22 = vsel %vm437_vm1, %v432_v17, %v434_v16 }
  0xaf   : > { %v436_v19 = vpop.permute.xlu0 %435  ;;  %v428_v20 = vpop.permute.xlu1 %427 }
  0xb0   : > { %v441_v21 = vsel %vm437_vm1, %v434_v16, %v436_v19 }
  0xb1   : > { %470 = vmatprep.subr.mxu0 %v441_v21 }
  0xb2   : > { %471 = vmatpush1.msra.mxu0 %v440_v22 }
  0xb3   : > { %v430_v25 = vpop.permute.xlu0 %429  ;;  %v426_v26 = vpop.permute.xlu1 %425 }
  0xb4   : > { %v439_v27 = vsel %vm437_vm1, %v428_v20, %v430_v25  ;;  %v438_v28 = vsel %vm437_vm1, %v426_v26, %v428_v20 }
  0xb5   : > { %472 = vmatprep.subr.mxu0 %v439_v27 }
  0xb6   : > { %473 = vmatpush1.msra.mxu0 %v438_v28 }
  0xb7   : > { %v342_v30 = vpop.permute.xlu0 %341  ;;  %v344_v31 = vpop.permute.xlu1 %343 }
  0xb8   : > { %v349_v32 = vsel %vm345_vm2, %v342_v30, %v344_v31 }
  0xb9   : > { %661 = vmatprep.subr.msk.mxu0 %vm227_vm3, %v349_v32 }
  0xbb   : > { %v340_v33 = vpop.permute.xlu0 %339  ;;  %v336_v34 = vpop.permute.xlu1 %335 }
  0xbc   : > { %v348_v35 = vsel %vm345_vm2, %v340_v33, %v342_v30 }
  0xbd   : > { %662 = vmatpush1.msk.msra.mxu0 %vm226_vm4, %v348_v35 }
  0xbf   : > { %v338_v37 = vpop.permute.xlu0 %337  ;;  %v334_v38 = vpop.permute.xlu1 %333 }
  0xc0   : > { %v347_v39 = vsel %vm345_vm2, %v336_v34, %v338_v37  ;;  %v346_v40 = vsel %vm345_vm2, %v334_v38, %v336_v34 }
  0xc1   : > { %663 = vmatprep.subr.msk.mxu0 %vm227_vm3, %v347_v39 }
  0xc2   : > { %664 = vmatpush1.msk.msra.mxu0 %vm226_vm4, %v346_v40 }
  0xc3   : > { %v317_v42 = vpop.permute.xlu0 %316  ;;  %v319_v43 = vpop.permute.xlu1 %318 }
  0xc4   : > { %v324_v44 = vsel %vm320_vm5, %v317_v42, %v319_v43  ;;  %v455_v43 = vsub.s32 0, %v1022_v8 }
  0xc5   : > { %665 = vmatprep.subr.msk.mxu0 %vm245_vm6, %v324_v44 }
  0xc6   : > { %v461_v23 = vrot.slane %v1030_v10, %v455_v43 }
  0xc7   : > { %v315_v45 = vpop.permute.xlu0 %314  ;;  %v311_v46 = vpop.permute.xlu1 %310 }
  0xc8   : > { %v323_v47 = vsel %vm320_vm5, %v315_v45, %v317_v42 }
  0xc9   : > { %666 = vmatpush1.msk.msra.mxu0 %vm244_vm7, %v323_v47 }
  0xcb   : > { %v313_v48 = vpop.permute.xlu0 %312  ;;  %v309_v49 = vpop.permute.xlu1 %308 }
  0xcc   : > { %v322_v50 = vsel %vm320_vm5, %v311_v46, %v313_v48  ;;  %v321_v51 = vsel %vm320_vm5, %v309_v49, %v311_v46 }
  0xcd   : > { %667 = vmatprep.subr.msk.mxu0 %vm245_vm6, %v322_v50  ;;  %v864_v50 = vmov 1966171168  }
  0xce   : > { %668 = vmatpush1.msk.msra.mxu0 %vm244_vm7, %v321_v51  ;;  %v551_v51 = vunpack.c.l.s4 %v864_v50 }
  0xcf   : > { %v413_v52 = vpop.permute.xlu0 %412  ;;  %v415_v53 = vpop.permute.xlu1 %414 }
  0xd0   : > { %v420_v54 = vsel %vm416_vm8, %v413_v52, %v415_v53  ;;  %v552_v36 = vunpack.c.0.s8 %v551_v51 }
  0xd1   : > { %482 = vmatprep.subr.mxu0 %v420_v54 }
  0xd3   : > { %v411_v55 = vpop.permute.xlu0 %410  ;;  %v407_v56 = vpop.permute.xlu1 %406 }
  0xd4   : > { %v419_v57 = vsel %vm416_vm8, %v411_v55, %v413_v52 }
  0xd5   : > { %483 = vmatpush1.msra.mxu0 %v419_v57  ;;  %v555_v57 = vsub.s32 %v552_v36, %v1022_v8 }
  0xd7   : > { %v409_v58 = vpop.permute.xlu0 %408  ;;  %v405_v59 = vpop.permute.xlu1 %404 }
  0xd8   : > { %v418_v60 = vsel %vm416_vm8, %v407_v56, %v409_v58  ;;  %v417_v61 = vsel %vm416_vm8, %v405_v59, %v407_v56 }
  0xd9   : > { %484 = vmatprep.subr.mxu0 %v418_v60 }
  0xda   : > { %485 = vmatpush1.msra.mxu0 %v417_v61 }
  0xdb   : > { %v292_v62 = vpop.permute.xlu0 %291  ;;  %v294_v63 = vpop.permute.xlu1 %293 }
  0xdc   : > { %v299_v0 = vsel %vm295_vm9, %v292_v62, %v294_v63 }
  0xdd   : > { %669 = vmatprep.subr.msk.mxu0 %vm227_vm3, %v299_v0 }
  0xdf   : > { %v290_v3 = vpop.permute.xlu0 %289  ;;  %v286_v5 = vpop.permute.xlu1 %285 }
  0xe0   : > { %v298_v9 = vsel %vm295_vm9, %v290_v3, %v292_v62 }
  0xe1   : > { %670 = vmatpush1.msk.msra.mxu0 %vm226_vm4, %v298_v9 }
  0xe3   : > { %v288_v11 = vpop.permute.xlu0 %287  ;;  %v284_v12 = vpop.permute.xlu1 %283 }
  0xe4   : > { %v297_v13 = vsel %vm295_vm9, %v286_v5, %v288_v11  ;;  %v296_v14 = vsel %vm295_vm9, %v284_v12, %v286_v5 }
  0xe5   : > { %671 = vmatprep.subr.msk.mxu0 %vm227_vm3, %v297_v13 }
  0xe6   : > { %672 = vmatpush1.msk.msra.mxu0 %vm226_vm4, %v296_v14 }
  0xe7   : > { %v267_v15 = vpop.permute.xlu0 %266  ;;  %v269_v16 = vpop.permute.xlu1 %268 }
  0xe8   : > { %v274_v17 = vsel %vm270_vm10, %v267_v15, %v269_v16 }
  0xe9   : > { %673 = vmatprep.subr.msk.mxu0 %vm245_vm6, %v274_v17 }
  0xeb   : > { %v265_v18 = vpop.permute.xlu0 %264  ;;  %v261_v19 = vpop.permute.xlu1 %260 }
  0xec   : > { %v273_v20 = vsel %vm270_vm10, %v265_v18, %v267_v15 }
  0xed   : > { %674 = vmatpush1.msk.msra.mxu0 %vm244_vm7, %v273_v20 }
  0xef   : > { %v263_v21 = vpop.permute.xlu0 %262  ;;  %v259_v22 = vpop.permute.xlu1 %258 }
  0xf0   : > { %v272_v24 = vsel %vm270_vm10, %v261_v19, %v263_v21  ;;  %v271_v25 = vsel %vm270_vm10, %v259_v22, %v261_v19 }
  0xf1   : > { %675 = vmatprep.subr.msk.mxu0 %vm245_vm6, %v272_v24 }
  0xf2   : > { %676 = vmatpush1.msk.msra.mxu0 %vm244_vm7, %v271_v25 }
  0xf3   : > { %v392_v26 = vpop.permute.xlu0 %391  ;;  %v394_v27 = vpop.permute.xlu1 %393 }
  0xf4   : > { %v399_v28 = vsel %vm395_vm11, %v392_v26, %v394_v27 }
  0xf5   : > { %494 = vmatprep.subr.mxu0 %v399_v28 }
  0xf7   : > { %v390_v30 = vpop.permute.xlu0 %389  ;;  %v386_v31 = vpop.permute.xlu1 %385 }
  0xf8   : > { %v398_v32 = vsel %vm395_vm11, %v390_v30, %v392_v26 }
  0xf9   : > { %495 = vmatpush1.msra.mxu0 %v398_v32 }
  0xfb   : > { %v388_v33 = vpop.permute.xlu0 %387  ;;  %v384_v34 = vpop.permute.xlu1 %383 }
  0xfc   : > { %v397_v35 = vsel %vm395_vm11, %v386_v31, %v388_v33  ;;  %v396_v37 = vsel %vm395_vm11, %v384_v34, %v386_v31 }
  0xfd   : > { %496 = vmatprep.subr.mxu0 %v397_v35 }
  0xfe   : > { %497 = vmatpush1.msra.mxu0 %v396_v37 }
  0xff   : > { %v367_v38 = vpop.permute.xlu0 %366  ;;  %677 = vmatprep.subr.msk.mxu0 %vm227_vm3, %v988_v1  ;;  %v369_v39 = vpop.permute.xlu1 %368 }
 0x100   : > { %678 = vmatpush1.msk.msra.mxu0 %vm226_vm4, %v990_v2  ;;  %v374_v40 = vsel %vm370_vm12, %v367_v38, %v369_v39 }
 0x101   : > { %679 = vmatprep.subr.msk.mxu0 %vm227_vm3, %v994_v4 }
 0x102   : > { %680 = vmatpush1.msk.msra.mxu0 %vm226_vm4, %v997_v6 }
 0x103   : > { %v365_v42 = vpop.permute.xlu0 %364  ;;  %681 = vmatprep.subr.msk.mxu0 %vm245_vm6, %v374_v40  ;;  %v361_v1 = vpop.permute.xlu1 %360 }
 0x104   : > { %v373_v44 = vsel %vm370_vm12, %v365_v42, %v367_v38 }
 0x105   : > { %682 = vmatpush2.msk.msra.mxu0 %vm244_vm7, %v373_v44 }
 0x107   : > { %v363_v2 = vpop.permute.xlu0 %362  ;;  %v359_v4 = vpop.permute.xlu1 %358 }
 0x108   : > { %v372_v45 = vsel %vm370_vm12, %v361_v1, %v363_v2  ;;  %v371_v6 = vsel %vm370_vm12, %v359_v4, %v361_v1 }
 0x109   : > { %683 = vmatprep.subr.msk.mxu0 %vm245_vm6, %v372_v45 }
 0x10a   : > { %684 = vmatpush2.msk.msra.mxu0 %vm244_vm7, %v371_v6 }
 0x10b   : > { %535 = vmatmul.mubr.f32.vlgmr.msra.gmra.mxu0 %v461_v23 }
 0x114   : > { %v451_v29 = vpop.permute.xlu0 %450 }
 0x115   : > { %v456_v46 = vrot.slane %v451_v29, %v455_v43 }
 0x1cb   : > { %v536_v47 = vpop.f32.mrf.mxu0 }
 0x1cc   : > { %v537_v48 = vadd.f32 %v536_v47, %v456_v46 }
 0x1cd   : > { %v538_v49 = vpop.f32.mrf.mxu0 }
 0x1ce   : > { %754 = vtanh.f32 %v537_v48  ;;  %v539_v10 = vadd.f32 %v538_v49, %v456_v46 }
 0x1d0   : > { %756 = vtanh.f32 %v539_v10 }
 0x1db   : > { %v755_v52 = vpop.eup %754 }
 0x1dc   : > { %v543_v53 = vmul.f32 0.5, %v755_v52 }
 0x1dd   : > { %v757_v54 = vpop.eup %756 }
 0x1de   : > { %v544_v41 = vmul.f32 0.5, %v757_v54  ;;  %v545_v55 = vadd.f32 0.5, %v543_v53 }
 0x1e0   : > { %v546_v56 = vadd.f32 0.5, %v544_v41 }
 0x1e2   : > { %v549_v58 = vcombine.low %v545_v55, %v546_v56 }
 0x1e4   : > { %v556_v59 = vrot.slane %v549_v58, %v555_v57 }
 0x1e6   : > { %v563_v60 = vrot.slane %v556_v59, %v555_v57 }
 0x1e8   : > { %569 = vst.msk [vmem:[%s190_s27] sm:$0x3] %vm567_vm13, %v563_v60 }
 0x1e9   : > { %799 = shalt.err (!%p796_p10)
}
 0x1ea   : > { %s800_s7 = scalar_lea.hbm %s583_s9, 32  ;;  %s804_s11 = scalar_lea.hbm %s1158_s3, 64 }
 0x1eb   : > { %p801_p0 = scmp.ne.s32.totalorder %s583_s9, %s800_s7  ;;  %p805_p1 = scmp.lt.s32.totalorder %s583_s9, %s1158_s3 }
 0x1ec   : > { %p806_p3 = scmp.lt.s32.totalorder %s804_s11, %s800_s7 }
 0x1ed   : > { %p802_p2 = pnand %p801_p0, %p1166_p12 }
 0x1ee   : > { %p807_p6 = por %p806_p3, %p805_p1 }
 0x1ef   : > { %p803_p9 = pneg %p802_p2 }
 0x1f1   : > { %p808_p11 = pnand %p807_p6, %p803_p9 }
 0x1f3   : > { %811 = shalt.err (!%p808_p11)
}
 0x1f4   : > { %697 = dma.vmem_to_hbm [thread:$0]  (%p1166_p12), %s586_s28, 32, %s583_s9, %s571_s10  }
 0x1f5 PF: > { %s597_s18 = sand.u32 1, %s838_s14   ;;  %p1167_p13 = scmp.ne.s32.totalorder %s1163_s25, 0 }
 0x1f6   : > { %p1168_p4 = scmp.ge.s32.totalorder %s850_s17, 2  ;;  %s598_s20 = scalar_lea.sflag [#allocation5], %s597_s18 }
 0x1f8   : > { %p704_p5 = pnand %p1168_p4, %p1167_p13 }
 0x1fa   : > { %p705_p7 = pneg %p704_p5 }
 0x1fc   : > { %833 = dma.done.wait (%p705_p7), %s598_s20, 32  }
 0x1fd   : > { %835 = vsyncadd (%p705_p7), %s598_s20, 4294967264  ;;  %p18_p8 = scmp.ge.s32.totalorder %s914_s19, 4   ;;  %s1169_s14 = smov %s842_s15 }
 0x1fe   : > { %s1170_s15 = smov %s846_s16  ;;  %s1171_s16 = smov %s926_s22 }
 0x1ff   : > { %s1172_s17 = smov %s914_s19  ;;  %20 = sbr.rel (!%p18_p8) target bundleno = 8 (0x8), region = 77 }
 0x204   :  { %603 = vsyncpa [#allocation4], 1 }
 0x205   :  { %605 = vsyncpa [#allocation4 + $0x1], 1 }
 0x206   :  { %606 = vsyncpa [#allocation5], 1 }
 0x207   :  { %608 = vsyncpa [#allocation5 + $0x1], 1 }

</bundles_post_ra>
